<compile_context>
chip_gen: v7x
topology: tpu7x:2x2x1
jax: 0.10.0
libtpu: 0.0.40
codegen_flags: <defaults>
</compile_context>

<pallas_src>
import functools

import jax
import jax.numpy as jnp
from jax import lax
from jax.experimental import pallas as pl
from jax.experimental.pallas import tpu as pltpu

LANE = 128
BLOCK_BYTES = 2 * 1024 * 1024   # ~2 MiB per input block (per grid step)
PAD_LOGIT = -1e4                # with target 0 -> per-element focal loss == 0


def _int_pow(x, p):
    """x**p for small positive integer p via exponentiation by squaring."""
    result = None
    base = x
    while p > 0:
        if p & 1:
            result = base if result is None else result * base
        p >>= 1
        if p:
            base = base * base
    return result


def _focal_loss_kernel(alpha_ref, x_ref, t_ref, o_ref, *, gamma, use_alpha,
                       tm, valid_rows, need_mask):
    x = x_ref[...].astype(jnp.float32)
    t = t_ref[...].astype(jnp.float32)

    # Binary targets assumed: z = (2t-1)*x, |z| == |x|.
    #   bce = max(x,0) - x*t + log1p(exp(-|x|)) == max(-z, 0) + log1p(exp(-|x|))
    z = (2.0 * t - 1.0) * x
    s = jnp.exp(-jnp.abs(x))          # EUP
    l = jnp.log1p(s)                  # EUP
    bce = jnp.maximum(-z, 0.0) + l

    g = float(gamma)
    if g == 0.0:
        focal = bce
    elif g == float(int(g)) and 1 <= int(g) <= 8:
        # 1 - pt = sigmoid(-z) = where(z>=0, s, 1) / (1 + s)
        one_m_pt = jnp.where(z >= 0.0, s, 1.0) * pl.reciprocal(1.0 + s,
                                                               approx=True)
        focal = _int_pow(one_m_pt, int(g)) * bce
    else:
        # (1 - pt)**g = exp(g * log(sigmoid(-z))) = exp(-g * (max(z,0) + l))
        focal = jnp.exp(-g * (jnp.maximum(z, 0.0) + l)) * bce

    if use_alpha:
        a0 = alpha_ref[0]
        a1 = alpha_ref[1]
        focal = jnp.where(t != 0.0, a1, a0) * focal

    if need_mask:
        # Last block overhangs the array: zero out garbage rows before reducing.
        row = pl.program_id(0) * tm + lax.broadcasted_iota(
            jnp.int32, (tm, LANE), 0)
        focal = jnp.where(row < valid_rows, focal, 0.0)

    # (tm, 128) -> (8, 128) partial using only elementwise vreg adds (VALU);
    # the single expensive cross-lane reduce happens once, outside the kernel.
    o_ref[...] = jnp.sum(focal.reshape(tm // 8, 8, LANE), axis=0)


def binary_focal_loss(inputs, targets, alpha=None, gamma=1.0):
    """Pallas equivalent of BinaryFocalLoss(alpha, gamma).forward(inputs, targets)."""
    x = inputs.reshape(-1)
    t = targets.reshape(-1)
    n = x.shape[0]

    # Only pad to the next LANE multiple (and at least 8 rows) so the flat
    # buffer reshapes to a lane-dense [rows, 128] slab.  Padded elements are
    # neutral (loss exactly 0); no full-array pad for ragged row counts.
    rows = max(int(pl.cdiv(n, LANE)), 8)
    total = rows * LANE
    if total != n:
        x = jnp.pad(x, (0, total - n), constant_values=PAD_LOGIT)
        t = jnp.pad(t, (0, total - n), constant_values=0)
    x2 = x.reshape(rows, LANE)
    t2 = t.reshape(rows, LANE)

    # Block sizing: ~2 MiB per input block for the widest streamed dtype;
    # keep >= 2 blocks whenever possible so the "parallel" axis shards across
    # both v7x TensorCores.  2 inputs x 3 buffers x 2 MiB = 12 MiB < v5e's
    # 16 MiB default scoped-VMEM limit.
    itemsize = max(x2.dtype.itemsize, t2.dtype.itemsize)
    tm_max = max(8, (BLOCK_BYTES // (LANE * itemsize)) // 8 * 8)
    half8 = ((int(pl.cdiv(rows, 2)) + 7) // 8) * 8
    tm = int(min(tm_max, max(8, half8)))
    num_blocks = int(pl.cdiv(rows, tm))
    need_mask = (num_blocks * tm != rows)

    use_alpha = alpha is not None
    alpha_arr = (jnp.asarray(alpha, jnp.float32) if use_alpha
                 else jnp.zeros((2,), jnp.float32))

    kernel = functools.partial(
        _focal_loss_kernel, gamma=float(gamma), use_alpha=use_alpha,
        tm=tm, valid_rows=rows, need_mask=need_mask)

    # Triple-buffer the streamed inputs only when the grid is long enough to
    # benefit (hides per-step DMA issue latency/jitter).
    if num_blocks >= 3:
        in_block = pl.BlockSpec((tm, LANE), lambda i: (i, 0),
                                pipeline_mode=pl.Buffered(3))
    else:
        in_block = pl.BlockSpec((tm, LANE), lambda i: (i, 0))

    cost = pl.CostEstimate(
        flops=12 * total,
        transcendentals=3 * total,
        bytes_accessed=total * (x2.dtype.itemsize + t2.dtype.itemsize)
        + num_blocks * 8 * LANE * 4,
    )

    partials = pl.pallas_call(
        kernel,
        out_shape=jax.ShapeDtypeStruct((num_blocks * 8, LANE), jnp.float32),
        grid=(num_blocks,),
        in_specs=[
            pl.BlockSpec(memory_space=pltpu.MemorySpace.SMEM),  # alpha (2,)
            in_block,                                           # logits
            in_block,                                           # targets
        ],
        out_specs=pl.BlockSpec((8, LANE), lambda i: (i, 0)),
        compiler_params=pltpu.CompilerParams(
            dimension_semantics=("parallel",)),                 # megacore on v7x
        cost_estimate=cost,
    )(alpha_arr, x2, t2)

    # Tiny final reduction of per-block partial sums; mean over the true N.
    return jnp.sum(partials) / jnp.float32(n)


def _reference(inputs, targets, alpha=None, gamma=1.0):
    x = inputs.astype(jnp.float32)
    t = targets.astype(jnp.float32)
    bce = jnp.maximum(x, 0.0) - x * t + jnp.log1p(jnp.exp(-jnp.abs(x)))
    pt = jnp.exp(-bce)
    if alpha is not None:
        at = jnp.asarray(alpha, jnp.float32)[t.astype(jnp.int32)]
    else:
        at = 1.0
    return jnp.mean(at * (1.0 - pt) ** gamma * bce)


if __name__ == "__main__":
    key = jax.random.PRNGKey(0)
    k1, k2, k3, k4, k5, k6 = jax.random.split(key, 6)

    # NCHW-like logits and binary targets.
    logits = jax.random.normal(k1, (2, 4, 16, 16), dtype=jnp.float32)
    targets = jax.random.bernoulli(k2, 0.5, (2, 4, 16, 16)).astype(jnp.float32)

    # Tolerances are loose enough for the approximate EUP reciprocal path.
    RTOL, ATOL = 5e-3, 5e-4

    # Default module config: alpha=None, gamma=1 (integer-gamma fast path).
    loss = binary_focal_loss(logits, targets, alpha=None, gamma=1.0)
    jax.block_until_ready(loss)
    ref = _reference(logits, targets, alpha=None, gamma=1.0)
    assert jnp.allclose(loss, ref, rtol=RTOL, atol=ATOL), (loss, ref)

    # Alpha path + integer gamma=2 (exponentiation by squaring, no pow).
    alpha = jnp.asarray([0.25, 0.75], jnp.float32)
    loss_a = binary_focal_loss(logits.reshape(-1), targets.reshape(-1),
                               alpha=alpha, gamma=2.0)
    jax.block_until_ready(loss_a)
    ref_a = _reference(logits.reshape(-1), targets.reshape(-1),
                       alpha=alpha, gamma=2.0)
    assert jnp.allclose(loss_a, ref_a, rtol=RTOL, atol=ATOL), (loss_a, ref_a)

    # Ragged size (pad-to-LANE path) + non-integer gamma (exp reformulation).
    logits_r = jax.random.normal(k3, (3, 5, 7), dtype=jnp.float32)
    targets_r = jax.random.bernoulli(k4, 0.5, (3, 5, 7)).astype(jnp.float32)
    loss_r = binary_focal_loss(logits_r, targets_r, alpha=alpha, gamma=1.5)
    jax.block_until_ready(loss_r)
    ref_r = _reference(logits_r, targets_r, alpha=alpha, gamma=1.5)
    assert jnp.allclose(loss_r, ref_r, rtol=RTOL, atol=ATOL), (loss_r, ref_r)

    # Ragged row count -> overhanging last block exercises the in-kernel mask.
    logits_m = jax.random.normal(k5, (4, 3, 37, 53), dtype=jnp.float32)
    targets_m = jax.random.bernoulli(k6, 0.5, (4, 3, 37, 53)).astype(jnp.float32)
    loss_m = binary_focal_loss(logits_m, targets_m, alpha=None, gamma=2.0)
    jax.block_until_ready(loss_m)
    ref_m = _reference(logits_m, targets_m, alpha=None, gamma=2.0)
    assert jnp.allclose(loss_m, ref_m, rtol=RTOL, atol=ATOL), (loss_m, ref_m)

    print("KERNEL_OK")
</pallas_src>

<mosaic_0001>
module attributes {stable_mosaic.version = 11 : i64} {
  func.func @_focal_loss_kernel(%arg0: i32, %arg1: memref<2xf32, #tpu.memory_space<smem>>, %arg2: memref<8x128xf32, #tpu.memory_space<vmem>>, %arg3: memref<8x128xf32, #tpu.memory_space<vmem>>, %arg4: memref<8x128xf32, #tpu.memory_space<vmem>>) attributes {dimension_semantics = [#tpu.dimension_semantics<parallel>], iteration_bounds = array<i64: 2>, scalar_prefetch = 0 : i64, scratch_operands = 0 : i64, tpu.core_type = #tpu.core_type<tc>, window_params = [{transform_indices = @transform_0, window_bounds = array<i64: 2>}, {transform_indices = @transform_1, window_bounds = array<i64: 8, 128>}, {transform_indices = @transform_2, window_bounds = array<i64: 8, 128>}, {transform_indices = @transform_3, window_bounds = array<i64: 8, 128>}]} {
    %c0 = arith.constant 0 : index
    %c0_0 = arith.constant 0 : index
    %0 = vector.load %arg2[%c0, %c0_0] : memref<8x128xf32, #tpu.memory_space<vmem>>, vector<8x128xf32>
    %c0_1 = arith.constant 0 : index
    %c0_2 = arith.constant 0 : index
    %1 = vector.load %arg3[%c0_1, %c0_2] : memref<8x128xf32, #tpu.memory_space<vmem>>, vector<8x128xf32>
    %cst = arith.constant 2.000000e+00 : f32
    %2 = vector.broadcast %cst : f32 to vector<8x128xf32>
    %3 = arith.mulf %2, %1 : vector<8x128xf32>
    %cst_3 = arith.constant 1.000000e+00 : f32
    %4 = vector.broadcast %cst_3 : f32 to vector<8x128xf32>
    %5 = arith.subf %3, %4 : vector<8x128xf32>
    %6 = arith.mulf %5, %0 : vector<8x128xf32>
    %7 = math.absf %0 : vector<8x128xf32>
    %cst_4 = arith.constant 0.000000e+00 : f32
    %8 = vector.broadcast %cst_4 : f32 to vector<8x128xf32>
    %9 = arith.subf %8, %7 : vector<8x128xf32>
    %10 = math.exp %9 : vector<8x128xf32>
    %11 = math.log1p %10 : vector<8x128xf32>
    %cst_5 = arith.constant 0.000000e+00 : f32
    %12 = vector.broadcast %cst_5 : f32 to vector<8x128xf32>
    %13 = arith.subf %12, %6 : vector<8x128xf32>
    %cst_6 = arith.constant 0.000000e+00 : f32
    %14 = vector.broadcast %cst_6 : f32 to vector<8x128xf32>
    %15 = arith.maximumf %13, %14 : vector<8x128xf32>
    %16 = arith.addf %15, %11 : vector<8x128xf32>
    %cst_7 = arith.constant 0.000000e+00 : f32
    %17 = vector.broadcast %cst_7 : f32 to vector<8x128xf32>
    %18 = arith.cmpf oge, %6, %17 : vector<8x128xf32>
    %cst_8 = arith.constant 1.000000e+00 : f32
    %19 = vector.broadcast %cst_8 : f32 to vector<8x128xf32>
    %20 = arith.select %18, %10, %19 : vector<8x128xi1>, vector<8x128xf32>
    %cst_9 = arith.constant 1.000000e+00 : f32
    %21 = vector.broadcast %cst_9 : f32 to vector<8x128xf32>
    %22 = arith.addf %21, %10 : vector<8x128xf32>
    %23 = tpu.reciprocal %22 {approx = true} : vector<8x128xf32> -> vector<8x128xf32>
    %24 = arith.mulf %20, %23 : vector<8x128xf32>
    %25 = arith.mulf %24, %16 : vector<8x128xf32>
    %26 = vector.shape_cast %25 : vector<8x128xf32> to vector<1x8x128xf32>
    %cst_10 = arith.constant dense<0.000000e+00> : vector<8x128xf32>
    %27 = vector.multi_reduction <add>, %26, %cst_10 [0] : vector<1x8x128xf32> to vector<8x128xf32>
    %c0_11 = arith.constant 0 : index
    %c0_12 = arith.constant 0 : index
    %28 = vector.load %arg4[%c0_11, %c0_12] : memref<8x128xf32, #tpu.memory_space<vmem>>, vector<8x128xf32>
    tpu.vector_store %arg4[%c0_11, %c0_12], %27 {strides = array<i32>} : memref<8x128xf32, #tpu.memory_space<vmem>>, vector<8x128xf32>,
    return
  }
  func.func @transform_0(%arg0: i32) -> i32 {
    %c0_i32 = arith.constant 0 : i32
    %c0_i32_0 = arith.constant 0 : i32
    return %c0_i32 : i32
  }
  func.func @transform_1(%arg0: i32) -> (i32, i32) {
    %c0_i32 = arith.constant 0 : i32
    %c0_i32_0 = arith.constant 0 : i32
    return %arg0, %c0_i32 : i32, i32
  }
  func.func @transform_2(%arg0: i32) -> (i32, i32) {
    %c0_i32 = arith.constant 0 : i32
    %c0_i32_0 = arith.constant 0 : i32
    return %arg0, %c0_i32 : i32, i32
  }
  func.func @transform_3(%arg0: i32) -> (i32, i32) {
    %c0_i32 = arith.constant 0 : i32
    %c0_i32_0 = arith.constant 0 : i32
    return %arg0, %c0_i32 : i32, i32
  }
}

</mosaic_0001>

<bundles_post_ra>
// kernel: tpu_custom_call.1
= control target key start
LH: loop header
LB: loop body
LE: loop exit
PB: predicated region body
PF: predicated region fallthrough
CT: control target
= control target key end

     0   :  { %8 = vsyncpa [#allocation5], 0  ;;  %s882_s0 = inlined_call_operand.hbm [shape: f32[2], index: 0, kind: input, shape index: {}]   ;;  %s883_s1 = inlined_call_operand.hbm [shape: f32[16,128], index: 1, kind: input, shape index: {}]   ;;  %s884_s2 = inlined_call_operand.hbm [shape: f32[16,128], index: 2, kind: input, shape index: {}]   ;;  %s885_s3 = inlined_call_operand.hbm [shape: f32[16,128], index: 3, kind: output, shape index: {}]  }
   0x1   :  { %9 = vsyncpa [#allocation3], 0 }
   0x2   :  { %11 = vsyncpa [#allocation3 + $0x1], 0 }
   0x3   :  { %12 = vsyncpa [#allocation8], 0 }
   0x4   :  { %14 = vsyncpa [#allocation8 + $0x1], 0 }
   0x5   :  { %15 = vsyncpa [#allocation4], 0 }
   0x6   :  { %17 = vsyncpa [#allocation4 + $0x1], 0  ;;  %s642_s12 = smov 0   ;;  %s644_s13 = smov 0  }
   0x7   :  { %s646_s14 = smov 0   ;;  %s648_s15 = smov 0  }
   0x8 LB: > { %s663_s16 = sadd.s32 4294967295, %s616_s15   ;;  %s383_s17 = sadd.s32 4294967294, %s616_s15   ;;  %s616_s15 = sphi %s648_s15, %s907_s15   ;;  %s612_s14 = sphi %s646_s14, %s906_s14   ;;  %s608_s13 = sphi %s644_s13, %s905_s13   ;;  %s604_s12 = sphi %s642_s12, %s904_s12  }
   0x9   : > { %s667_s18 = sadd.s32 1, %s616_s15   ;;  %s51_s19 = sadd.s32 1, %s612_s14 }
   0xa   : > { %s48_s20 = ssub.s32 %s616_s15, %s667_s18  ;;  %p58_p0 = scmp.ne.s32.totalorder %s612_s14, %s608_s13 }
   0xb   : > { %p49_p1 = scmp.eq.s32.totalorder %s48_s20, 0  ;;  %p64_p2 = scmp.ne.s32.totalorder %s608_s13, %s604_s12 }
   0xc   : > { %p886_p3 = scmp.eq.s32.totalorder %s663_s16, 0  ;;  %p114_p4 = scmp.eq.s32.totalorder %s663_s16, 1 }
   0xd   : > { %s679_s21 = scalar_select %p49_p1, %s612_s14, %s51_s19  }
   0xe   : > { %p683_p5 = por %p886_p3, %p64_p2  ;;  %p690_p6 = por %p114_p4, %p58_p0 }
   0xf   : > { %p120_p7 = scmp.eq.s32.totalorder %s383_s17, 1  ;;  %p384_p8 = scmp.ge.s32.totalorder %s616_s15, 1 }
  0x10   : > { %s890_s22 = scalar_select %p683_p5, 1, 0 }
  0x11   : > { %s891_s23 = scalar_select %p690_p6, 1, 0 }
  0x12   : > { %p127_p9 = scmp.lt.s32.totalorder %s616_s15, 3  ;;  %p696_p10 = por %p120_p7, %p64_p2 }
  0x13   : > { %p59_p13 = scmp.eq.s32.totalorder %s616_s15, 0  ;;  %p427_p1 = scmp.lt.s32.totalorder %s616_s15, 2 }
  0x14   : > { %s892_s24 = scalar_select %p696_p10, 1, 0 }
  0x15   : > { %p700_p11 = pnand %p384_p8, %p127_p9  ;;  %s710_s26 = sand.u32 1, %s612_s14  }
  0x16   : > { %p715_p3 = por %p59_p13, %p58_p0  ;;  %p895_p2 = scmp.eq.s32.totalorder %s663_s16, 0 }
  0x17   : > { %s893_s25 = scalar_select %p700_p11, 1, 0 }
  0x18   : > { %p411_p4 = pneg %p700_p11  ;;  %s387_s28 = sshll.u32 %s710_s26, 3 }
  0x19   : > { %s388_s29 = sshll.u32 %s616_s15, 7  ;;  %s469_s8 = scalar_lea.hbm %s882_s0, 16 }
  0x1a   : > { %p412_p7 = pnand %p411_p4, %p895_p2  ;;  %s728_s5 = scalar_lea.hbm %s883_s1, %s388_s29 }
  0x1b   : > { %p470_p0 = scmp.ne.s32.totalorder %s882_s0, %s469_s8  ;;  %p476_p4 = scmp.lt.u32.totalorder %s469_s8, %s882_s0 }
  0x1c   : > { %p471_p8 = pneg %p412_p7 }
  0x1e   : > { %p472_p9 = pnand %p471_p8, %p470_p0 }
  0x20   : > { %p473_p13 = pneg %p472_p9 }
  0x22   : > { %p478_p2 = pnand %p476_p4, %p473_p13 }
  0x24   : > { %481 = shalt.err (!%p478_p2)
}
  0x25   : > { %s618_s19 = smov [#allocation2]   ;;  %s153_s4 = scalar_lea.vmem [#allocation6], %s387_s28 }
  0x26   : > { %414 = dma.hbm_to_smem (!%p412_p7), %s882_s0, 16, %s618_s19, [#allocation5]  }
  0x27   : > { %s160_s6 = sshll.u32 %s153_s4, 4  ;;  %p748_p0 = pnand %p427_p1, %p715_p3  ;;  %s752_s6 = int_to_ptr.vmem [resolvable:$true] %s160_s6 }
  0x28   : > { %s150_s8 = scalar_lea.sflag [#allocation3], %s710_s26  ;;  %s482_s9 = scalar_lea.hbm %s728_s5, 128 }
  0x29   : > { %p483_p8 = scmp.ne.s32.totalorder %s728_s5, %s482_s9  ;;  %p484_p9 = pneg %p748_p0 }
  0x2a   : > { %s487_s11 = scalar_lea.hbm %s883_s1, 256  ;;  %p488_p3 = scmp.lt.u32.totalorder %s728_s5, %s883_s1 }
  0x2b   : > { %p485_p7 = pnand %p484_p9, %p483_p8  ;;  %p489_p1 = scmp.lt.u32.totalorder %s487_s11, %s482_s9 }
  0x2c   : > { %p491_p2 = scmp.lt.u32.totalorder %s482_s9, %s728_s5 }
  0x2d   : > { %p486_p13 = pneg %p485_p7  ;;  %p490_p4 = por %p489_p1, %p488_p3 }
  0x2f   : > { %p492_p12 = por %p491_p2, %p490_p4 }
  0x31   : > { %p493_p10 = pnand %p492_p12, %p486_p13 }
  0x33   : > { %496 = shalt.err (!%p493_p10)
}
  0x34   : > { %s497_s20 = scalar_lea.vmem %s752_s6, 128  ;;  %s619_s30 = smov [#allocation6]  }
  0x35   : > { %p498_p8 = scmp.ne.s32.totalorder %s752_s6, %s497_s20  ;;  %s502_s4 = sshll.u32 %s619_s30, 4  ;;  %s503_s4 = int_to_ptr.vmem [resolvable:$false] %s502_s4 }
  0x36   : > { %s504_s10 = scalar_lea.vmem %s503_s4, 256  ;;  %p505_p5 = scmp.lt.s32.totalorder %s752_s6, %s503_s4 }
  0x37   : > { %p500_p7 = pnand %p498_p8, %p484_p9  ;;  %p506_p3 = scmp.lt.s32.totalorder %s504_s10, %s497_s20 }
  0x39   : > { %p501_p6 = pneg %p500_p7  ;;  %p507_p1 = por %p506_p3, %p505_p5 }
  0x3b   : > { %p508_p4 = pnand %p507_p1, %p501_p6 }
  0x3d   : > { %511 = shalt.err (!%p508_p4)
}
  0x3e   : > { %418 = dma.hbm_to_vmem [thread:$0]  (!%p748_p0), %s728_s5, 128, %s752_s6, %s150_s8  }
  0x3f   : > { %s785_s11 = scalar_lea.hbm %s884_s2, %s388_s29  ;;  %s171_s17 = scalar_lea.vmem [#allocation7], %s387_s28 }
  0x40   : > { %s178_s19 = sshll.u32 %s171_s17, 4  ;;  %s168_s20 = scalar_lea.sflag [#allocation8], %s710_s26  ;;  %s179_s19 = int_to_ptr.vmem [resolvable:$true] %s178_s19 }
  0x41   : > { %s512_s30 = scalar_lea.hbm %s785_s11, 128  ;;  %s517_s29 = scalar_lea.hbm %s884_s2, 256 }
  0x42   : > { %p513_p5 = scmp.ne.s32.totalorder %s785_s11, %s512_s30  ;;  %p518_p12 = scmp.lt.u32.totalorder %s785_s11, %s884_s2 }
  0x43   : > { %p519_p13 = scmp.lt.u32.totalorder %s517_s29, %s512_s30  ;;  %p521_p8 = scmp.lt.u32.totalorder %s512_s30, %s785_s11 }
  0x44   : > { %p515_p6 = pnand %p513_p5, %p484_p9 }
  0x45   : > { %p520_p2 = por %p519_p13, %p518_p12 }
  0x46   : > { %p516_p10 = pneg %p515_p6 }
  0x47   : > { %p522_p7 = por %p521_p8, %p520_p2 }
  0x49   : > { %p523_p3 = pnand %p522_p7, %p516_p10 }
  0x4b   : > { %526 = shalt.err (!%p523_p3)
}
  0x4c   : > { %s527_s26 = scalar_lea.vmem %s179_s19, 128  ;;  %s620_s28 = smov [#allocation7]  }
  0x4d   : > { %p528_p1 = scmp.ne.s32.totalorder %s179_s19, %s527_s26  ;;  %s532_s10 = sshll.u32 %s620_s28, 4  ;;  %s533_s10 = int_to_ptr.vmem [resolvable:$false] %s532_s10 }
  0x4e   : > { %s534_s9 = scalar_lea.vmem %s533_s10, 256  ;;  %p535_p6 = scmp.lt.s32.totalorder %s179_s19, %s533_s10 }
  0x4f   : > { %p530_p4 = pnand %p528_p1, %p484_p9  ;;  %p536_p11 = scmp.lt.s32.totalorder %s534_s9, %s527_s26 }
  0x51   : > { %p531_p5 = pneg %p530_p4  ;;  %p537_p12 = por %p536_p11, %p535_p6 }
  0x53   : > { %p538_p13 = pnand %p537_p12, %p531_p5 }
  0x55   : > { %541 = shalt.err (!%p538_p13)
}
  0x56   : > { %421 = dma.hbm_to_vmem [thread:$0]  (!%p748_p0), %s785_s11, 128, %s179_s19, %s168_s20  }
  0x57   : > { %p897_p10 = scmp.ne.s32.totalorder %s893_s25, 0 }
  0x58   : > { %p898_p2 = scmp.eq.s32.totalorder (!%p897_p10), %s663_s16, 0 }
  0x59   : > { %187 = sbr.rel (%p897_p10) target bundleno = 157 (0x9d), region = 32 }
  0x60   : > { %587 = dma.done.wait (%p898_p2), [#allocation5], 16   ;;  %p899_p9 = pmov %p898_p2 }
  0x61   : > { %s816_s27 = sand.u32 1, %s608_s13   ;;  %p900_p11 = scmp.ne.s32.totalorder %s890_s22, 0 }
  0x62   : > { %589 = vsyncadd (%p899_p9), [#allocation5], 4294967280  ;;  %s819_s17 = sshll.u32 %s816_s27, 3  ;;  %s194_s7 = scalar_lea.sflag [#allocation3], %s816_s27 }
  0x63   : > { %s197_s11 = scalar_lea.vmem [#allocation6], %s819_s17 }
  0x64   : > { %591 = dma.done.wait (%p900_p11), %s194_s7, 128  }
  0x65   : > { %593 = vsyncadd (%p900_p11), %s194_s7, 4294967168  ;;  %s203_s25 = scalar_lea.sflag [#allocation8], %s816_s27  ;;  %s206_s19 = scalar_lea.vmem [#allocation7], %s819_s17 }
  0x66   : > { %595 = dma.done.wait (%p900_p11), %s203_s25, 128  }
  0x67   : > { %597 = vsyncadd (%p900_p11), %s203_s25, 4294967168 }
  0x68   : > { %211 = sfence }
  0x69   : > { %v235_v0 = vld [vmem:[%s197_s11] sm:$0xff]  ;;  %v236_v4 = vld [vmem:[%s206_s19] sm:$0xff]  ;;  %s234_s22 = scalar_lea.vmem [#allocation9], %s819_s17  ;;  %s398_s30 = sshll.u32 %s663_s16, 7 }
  0x6a   : > { %v240_v1 = vand.u32 2147483647, %v235_v0  ;;  %v237_v5 = vmul.f32 2.0, %v236_v4  ;;  %s278_s20 = sshll.u32 %s234_s22, 4  ;;  %s840_s29 = scalar_lea.hbm %s885_s3, %s398_s30  ;;  %s835_s20 = int_to_ptr.vmem [resolvable:$true] %s278_s20 }
  0x6b   : > { %s265_s8 = scalar_lea.sflag [#allocation4], %s816_s27  ;;  %s542_s4 = scalar_lea.vmem %s835_s20, 128 }
  0x6c   : > { %v241_v2 = vsub.f32 0.0, %v240_v1  ;;  %v396_v7 = vadd.f32 -1.0, %v237_v5  ;;  %p543_p0 = scmp.ne.s32.totalorder %s835_s20, %s542_s4  ;;  %p901_p8 = scmp.ne.s32.totalorder %s891_s23, 0 }
  0x6d   : > { %s621_s16 = smov [#allocation9]  }
  0x6e   : > { %v242_v3 = vmul.f32 1.442695, %v241_v2  ;;  %v239_v10 = vmul.f32 %v396_v7, %v235_v0  ;;  %p544_p7 = pnand %p543_p0, %p901_p8  ;;  %s546_s26 = sshll.u32 %s621_s16, 4  ;;  %s547_s26 = int_to_ptr.vmem [resolvable:$false] %s546_s26 }
  0x6f   : > { %s548_s28 = scalar_lea.vmem %s547_s26, 256  ;;  %p549_p1 = scmp.lt.s32.totalorder %s835_s20, %s547_s26 }
  0x70   : > { %463 = vpow2.f32 %v242_v3  ;;  %v253_v13 = vsub.f32 0.0, %v239_v10  ;;  %vm256_vm0 = vcmp.ge.f32.partialorder %v239_v10, 0.0  ;;  %p545_p3 = pneg %p544_p7  ;;  %p550_p4 = scmp.lt.s32.totalorder %s548_s28, %s542_s4 }
  0x72   : > { %v254_v17 = vmax.f32 %v253_v13, 0.0  ;;  %p551_p5 = por %p550_p4, %p549_p1 }
  0x74   : > { %p552_p6 = pnand %p551_p5, %p545_p3 }
  0x7a   : > { %v464_v6 = vpop.eup %463 }
  0x7b   : > { %v244_v8 = vadd.f32 1.0, %v464_v6  ;;  %v247_v9 = vmul.f32 -0.5, %v464_v6  ;;  %v250_v12 = vand.u32 2147483647, %v464_v6  ;;  %v257_v15 = vsel %vm256_vm0, %v464_v6, 1.0 }
  0x7d   : > { %465 = vlog2.f32 %v244_v8  ;;  %v248_v11 = vadd.f32 1.0, %v247_v9  ;;  %vm251_vm1 = vcmp.lt.f32.partialorder %v250_v12, 0.0004427343 }
  0x7e   : > { %467 = vrcp.f32 %v244_v8 }
  0x7f   : > { %v249_v14 = vmul.f32 %v464_v6, %v248_v11 }
  0x87   : > { %v466_v16 = vpop.eup %465 }
  0x88   : > { %v468_v18 = vpop.eup %467  ;;  %v246_v19 = vmul.f32 0.6931472, %v466_v16 }
  0x89   : > { %v260_v20 = vmul.f32 %v468_v18, %v257_v15 }
  0x8a   : > { %v252_v21 = vsel %vm251_vm1, %v249_v14, %v246_v19 }
  0x8b   : > { %v255_v22 = vadd.f32 %v254_v17, %v252_v21 }
  0x8d   : > { %v261_v23 = vmul.f32 %v260_v20, %v255_v22 }
  0x8f   : > { %263 = vst [vmem:[%s234_s22] sm:$0xff] %v261_v23 }
  0x90   : > { %555 = shalt.err (!%p552_p6)
}
  0x91   : > { %s556_s10 = scalar_lea.hbm %s840_s29, 128  ;;  %s560_s17 = scalar_lea.hbm %s885_s3, 256 }
  0x92   : > { %p557_p12 = scmp.ne.s32.totalorder %s840_s29, %s556_s10  ;;  %p561_p2 = scmp.lt.u32.totalorder %s840_s29, %s885_s3 }
  0x93   : > { %p562_p9 = scmp.lt.u32.totalorder %s560_s17, %s556_s10  ;;  %p564_p0 = scmp.lt.u32.totalorder %s556_s10, %s840_s29 }
  0x94   : > { %p558_p13 = pnand %p557_p12, %p901_p8 }
  0x95   : > { %p563_p11 = por %p562_p9, %p561_p2 }
  0x96   : > { %p559_p10 = pneg %p558_p13 }
  0x97   : > { %p565_p7 = por %p564_p0, %p563_p11 }
  0x99   : > { %p566_p3 = pnand %p565_p7, %p559_p10 }
  0x9b   : > { %569 = shalt.err (!%p566_p3)
}
  0x9c   : > { %409 = dma.vmem_to_hbm [thread:$0]  (%p901_p8), %s835_s20, 128, %s840_s29, %s265_s8  }
  0x9d PF: > { %s290_s25 = sand.u32 1, %s604_s12   ;;  %p902_p1 = scmp.ne.s32.totalorder %s892_s24, 0 }
  0x9e   : > { %p903_p4 = scmp.ge.s32.totalorder %s616_s15, 2  ;;  %s291_s19 = scalar_lea.sflag [#allocation4], %s290_s25 }
  0xa0   : > { %p423_p5 = pnand %p903_p4, %p902_p1 }
  0xa2   : > { %599 = dma.done.wait (!%p423_p5), %s291_s19, 128  }
  0xa3   : > { %601 = vsyncadd (!%p423_p5), %s291_s19, 4294967168  ;;  %p20_p6 = scmp.ge.s32.totalorder %s667_s18, 4   ;;  %s904_s12 = smov %s608_s13 }
  0xa4   : > { %s905_s13 = smov %s612_s14  ;;  %s906_s14 = smov %s679_s21 }
  0xa5   : > { %s907_s15 = smov %s667_s18  ;;  %22 = sbr.rel (!%p20_p6) target bundleno = 8 (0x8), region = 95 }
  0xac   :  { %296 = vsyncpa [#allocation3], 1 }
  0xad   :  { %298 = vsyncpa [#allocation3 + $0x1], 1 }
  0xae   :  { %299 = vsyncpa [#allocation8], 1 }
  0xaf   :  { %301 = vsyncpa [#allocation8 + $0x1], 1 }
  0xb0   :  { %302 = vsyncpa [#allocation4], 1 }
  0xb1   :  { %304 = vsyncpa [#allocation4 + $0x1], 1 }
  0xb2   :  { %305 = vsyncpa [#allocation5], 1 }
  0xb3   :  { %307 = vsyncpa [#allocation5 + $0x1], 1 }

</bundles_post_ra>
